<compile_context>
chip_gen: v7x
topology: tpu7x:2x2x1
jax: 0.10.0
libtpu: 0.0.40
codegen_flags: <defaults>
</compile_context>

<pallas_src>
import functools

import jax
import jax.numpy as jnp
from jax.experimental import pallas as pl
from jax.experimental.pallas import tpu as pltpu

LANES = 128
MAX_BLOCK_ROWS = 2048          # (2048, 128) f32 tile = 1 MiB per input
PAD_CHUNK = 16 * LANES         # flat length rounded to this (sublane-safe even for bf16)
NUM_OUTER = 2                  # >= 2 so v7x can shard the stream across both TensorCores


def _loss_sums_kernel(y1_ref, y2_ref, lab_ref, out_ref,
                      *, block_rows, rows_total, mask_rows):
    """Accumulate per-lane partials of [sum(d1), sum(d1^2), sum(d2), sum(d2^2)].

    out_ref block: (1, 4, 8, 128) f32, resident across the inner (reduction) axis.
    """
    o = pl.program_id(0)
    i = pl.program_id(1)
    n_inner = pl.num_programs(1)

    @pl.when(i == 0)
    def _():
        out_ref[...] = jnp.zeros_like(out_ref)

    lab = lab_ref[...].astype(jnp.float32)
    d1 = y1_ref[...].astype(jnp.float32) - lab
    d2 = y2_ref[...].astype(jnp.float32) - lab

    if mask_rows:
        # Global (unclamped) row offset of this tile; rows >= rows_total hold
        # unspecified / duplicated data and must not enter the reduction.
        row0 = (o * n_inner + i) * block_rows
        row_ids = row0 + jax.lax.broadcasted_iota(
            jnp.int32, (block_rows, LANES), 0)
        valid = row_ids < rows_total
        d1 = jnp.where(valid, d1, 0.0)
        d2 = jnp.where(valid, d2, 0.0)

    # VPU-only accumulation: fold the tile down to one (8,128) vreg per
    # quantity with elementwise adds; the cross-lane reduction happens in JAX.
    t1 = d1.reshape(-1, 8, LANES)
    t2 = d2.reshape(-1, 8, LANES)
    out_ref[0, 0] += jnp.sum(t1, axis=0)
    out_ref[0, 1] += jnp.sum(t1 * t1, axis=0)
    out_ref[0, 2] += jnp.sum(t2, axis=0)
    out_ref[0, 3] += jnp.sum(t2 * t2, axis=0)


def _flatten_to_slab(x):
    """Flatten row-major to (rows, 128); zero-pad only if numel % PAD_CHUNK != 0."""
    flat = x.reshape(-1)
    n = flat.shape[0]
    pad = (-n) % PAD_CHUNK
    if pad:
        # Zero padding contributes 0 to every partial sum.
        flat = jnp.pad(flat, (0, pad))
    return flat.reshape(-1, LANES), n


@functools.partial(jax.jit, static_argnames=("r",))
def docunet_loss_pow(y1, y2, label, r=0.1):
    y1_2d, n = _flatten_to_slab(y1)
    y2_2d, _ = _flatten_to_slab(y2)
    lab_2d, _ = _flatten_to_slab(label)

    rows = y1_2d.shape[0]                       # multiple of 16
    block_rows = min(MAX_BLOCK_ROWS, rows)      # multiple of 8 (actually 16)
    total_blocks = pl.cdiv(rows, block_rows)
    g_outer = min(NUM_OUTER, total_blocks)
    inner = pl.cdiv(total_blocks, g_outer)
    # Masking is needed only if the grid over-covers the slab (partial tail
    # block and/or duplicated clamped blocks).
    mask_rows = (g_outer * inner * block_rows) != rows

    if g_outer * inner == total_blocks:
        def in_map(o, i):
            return (o * inner + i, 0)
    else:
        def in_map(o, i):
            # Clamp so the DMA'd block index is always in bounds; the
            # duplicated data is fully masked out in-kernel.
            return (jnp.minimum(o * inner + i, total_blocks - 1), 0)

    in_spec = pl.BlockSpec((block_rows, LANES), in_map)
    out_spec = pl.BlockSpec((1, 4, 8, LANES), lambda o, i: (o, 0, 0, 0))

    kernel = functools.partial(
        _loss_sums_kernel,
        block_rows=block_rows, rows_total=rows, mask_rows=mask_rows)

    partials = pl.pallas_call(
        kernel,
        out_shape=jax.ShapeDtypeStruct((g_outer, 4, 8, LANES), jnp.float32),
        grid_spec=pltpu.PrefetchScalarGridSpec(
            num_scalar_prefetch=0,
            grid=(g_outer, inner),
            in_specs=[in_spec, in_spec, in_spec],
            out_specs=out_spec,
        ),
        compiler_params=pltpu.CompilerParams(
            dimension_semantics=("parallel", "arbitrary")),
    )(y1_2d, y2_2d, lab_2d)

    sums = jnp.sum(partials, axis=(0, 2, 3))            # (4,)
    n_f = jnp.float32(n)
    mean_d1, mean_sq1 = sums[0] / n_f, sums[1] / n_f
    mean_d2, mean_sq2 = sums[2] / n_f, sums[3] / n_f
    # loss = mse(y1,label) + lossf1 + mse(y2,label) + lossf2
    loss = (2.0 * mean_sq1 - r * mean_d1 * mean_d1
            + 2.0 * mean_sq2 - r * mean_d2 * mean_d2)
    return loss


def _reference(y1, y2, label, r=0.1):
    d1 = y1 - label
    d2 = y2 - label
    lossf1 = jnp.mean(d1 ** 2) - r * jnp.mean(d1) ** 2
    lossf2 = jnp.mean(d2 ** 2) - r * jnp.mean(d2) ** 2
    return jnp.mean(d1 ** 2) + lossf1 + jnp.mean(d2 ** 2) + lossf2


if __name__ == "__main__":
    key = jax.random.PRNGKey(0)
    k1, k2, k3 = jax.random.split(key, 3)
    shape = (2, 4, 16, 16)  # NCHW, small synthetic shapes
    y1 = jax.random.normal(k1, shape, dtype=jnp.float32)
    y2 = jax.random.normal(k2, shape, dtype=jnp.float32)
    label = jax.random.normal(k3, shape, dtype=jnp.float32)

    loss = docunet_loss_pow(y1, y2, label, r=0.1)
    jax.block_until_ready(loss)

    ref = _reference(y1, y2, label, r=0.1)
    assert jnp.allclose(loss, ref, rtol=1e-5, atol=1e-5), (loss, ref)
    print("KERNEL_OK")
</pallas_src>

<mosaic_0001>
module attributes {stable_mosaic.version = 11 : i64} {
  func.func @_loss_sums_kernel(%arg0: i32, %arg1: i32, %arg2: memref<16x128xf32, #tpu.memory_space<vmem>>, %arg3: memref<16x128xf32, #tpu.memory_space<vmem>>, %arg4: memref<16x128xf32, #tpu.memory_space<vmem>>, %arg5: memref<1x4x8x128xf32, #tpu.memory_space<vmem>>) attributes {dimension_semantics = [#tpu.dimension_semantics<parallel>, #tpu.dimension_semantics<arbitrary>], iteration_bounds = array<i64: 1, 1>, scalar_prefetch = 0 : i64, scratch_operands = 0 : i64, tpu.core_type = #tpu.core_type<tc>, window_params = [{transform_indices = @transform_0, window_bounds = array<i64: 16, 128>}, {transform_indices = @transform_1, window_bounds = array<i64: 16, 128>}, {transform_indices = @transform_2, window_bounds = array<i64: 16, 128>}, {transform_indices = @transform_3, window_bounds = array<i64: 1, 4, 8, 128>}]} {
    %c0_i32 = arith.constant 0 : i32
    %0 = arith.cmpi eq, %arg1, %c0_i32 : i32
    %1 = arith.extui %0 : i1 to i32
    %c0_i32_0 = arith.constant 0 : i32
    %2 = arith.cmpi ne, %1, %c0_i32_0 : i32
    scf.if %2 {
      %cst_38 = arith.constant 0.000000e+00 : f32
      %40 = vector.broadcast %cst_38 : f32 to vector<1x4x8x128xf32>
      %c0_39 = arith.constant 0 : index
      %c0_40 = arith.constant 0 : index
      %c0_41 = arith.constant 0 : index
      %c0_42 = arith.constant 0 : index
      %41 = vector.load %arg5[%c0_39, %c0_40, %c0_41, %c0_42] : memref<1x4x8x128xf32, #tpu.memory_space<vmem>>, vector<1x4x8x128xf32>
      tpu.vector_store %arg5[%c0_39, %c0_40, %c0_41, %c0_42], %40 {strides = array<i32>} : memref<1x4x8x128xf32, #tpu.memory_space<vmem>>, vector<1x4x8x128xf32>,
    } else {
    }
    %c0 = arith.constant 0 : index
    %c0_1 = arith.constant 0 : index
    %3 = vector.load %arg4[%c0, %c0_1] : memref<16x128xf32, #tpu.memory_space<vmem>>, vector<16x128xf32>
    %c0_2 = arith.constant 0 : index
    %c0_3 = arith.constant 0 : index
    %4 = vector.load %arg2[%c0_2, %c0_3] : memref<16x128xf32, #tpu.memory_space<vmem>>, vector<16x128xf32>
    %5 = arith.subf %4, %3 : vector<16x128xf32>
    %c0_4 = arith.constant 0 : index
    %c0_5 = arith.constant 0 : index
    %6 = vector.load %arg3[%c0_4, %c0_5] : memref<16x128xf32, #tpu.memory_space<vmem>>, vector<16x128xf32>
    %7 = arith.subf %6, %3 : vector<16x128xf32>
    %8 = vector.shape_cast %5 : vector<16x128xf32> to vector<2x8x128xf32>
    %9 = vector.shape_cast %7 : vector<16x128xf32> to vector<2x8x128xf32>
    %c0_6 = arith.constant 0 : index
    %c0_7 = arith.constant 0 : index
    %c0_8 = arith.constant 0 : index
    %c0_9 = arith.constant 0 : index
    %10 = vector.load %arg5[%c0_6, %c0_7, %c0_8, %c0_9] : memref<1x4x8x128xf32, #tpu.memory_space<vmem>>, vector<1x1x8x128xf32>
    %11 = vector.shape_cast %10 : vector<1x1x8x128xf32> to vector<8x128xf32>
    %cst = arith.constant dense<0.000000e+00> : vector<8x128xf32>
    %12 = vector.multi_reduction <add>, %8, %cst [0] : vector<2x8x128xf32> to vector<8x128xf32>
    %13 = arith.addf %11, %12 : vector<8x128xf32>
    %c0_10 = arith.constant 0 : index
    %c0_11 = arith.constant 0 : index
    %c0_12 = arith.constant 0 : index
    %c0_13 = arith.constant 0 : index
    %14 = vector.load %arg5[%c0_10, %c0_11, %c0_12, %c0_13] : memref<1x4x8x128xf32, #tpu.memory_space<vmem>>, vector<1x1x8x128xf32>
    %15 = vector.shape_cast %14 : vector<1x1x8x128xf32> to vector<8x128xf32>
    %16 = vector.shape_cast %13 : vector<8x128xf32> to vector<1x1x8x128xf32>
    tpu.vector_store %arg5[%c0_10, %c0_11, %c0_12, %c0_13], %16 {strides = array<i32>} : memref<1x4x8x128xf32, #tpu.memory_space<vmem>>, vector<1x1x8x128xf32>,
    %c0_14 = arith.constant 0 : index
    %c1 = arith.constant 1 : index
    %c0_15 = arith.constant 0 : index
    %c0_16 = arith.constant 0 : index
    %17 = vector.load %arg5[%c0_14, %c1, %c0_15, %c0_16] : memref<1x4x8x128xf32, #tpu.memory_space<vmem>>, vector<1x1x8x128xf32>
    %18 = vector.shape_cast %17 : vector<1x1x8x128xf32> to vector<8x128xf32>
    %19 = arith.mulf %8, %8 : vector<2x8x128xf32>
    %cst_17 = arith.constant dense<0.000000e+00> : vector<8x128xf32>
    %20 = vector.multi_reduction <add>, %19, %cst_17 [0] : vector<2x8x128xf32> to vector<8x128xf32>
    %21 = arith.addf %18, %20 : vector<8x128xf32>
    %c0_18 = arith.constant 0 : index
    %c1_19 = arith.constant 1 : index
    %c0_20 = arith.constant 0 : index
    %c0_21 = arith.constant 0 : index
    %22 = vector.load %arg5[%c0_18, %c1_19, %c0_20, %c0_21] : memref<1x4x8x128xf32, #tpu.memory_space<vmem>>, vector<1x1x8x128xf32>
    %23 = vector.shape_cast %22 : vector<1x1x8x128xf32> to vector<8x128xf32>
    %24 = vector.shape_cast %21 : vector<8x128xf32> to vector<1x1x8x128xf32>
    tpu.vector_store %arg5[%c0_18, %c1_19, %c0_20, %c0_21], %24 {strides = array<i32>} : memref<1x4x8x128xf32, #tpu.memory_space<vmem>>, vector<1x1x8x128xf32>,
    %c0_22 = arith.constant 0 : index
    %c2 = arith.constant 2 : index
    %c0_23 = arith.constant 0 : index
    %c0_24 = arith.constant 0 : index
    %25 = vector.load %arg5[%c0_22, %c2, %c0_23, %c0_24] : memref<1x4x8x128xf32, #tpu.memory_space<vmem>>, vector<1x1x8x128xf32>
    %26 = vector.shape_cast %25 : vector<1x1x8x128xf32> to vector<8x128xf32>
    %cst_25 = arith.constant dense<0.000000e+00> : vector<8x128xf32>
    %27 = vector.multi_reduction <add>, %9, %cst_25 [0] : vector<2x8x128xf32> to vector<8x128xf32>
    %28 = arith.addf %26, %27 : vector<8x128xf32>
    %c0_26 = arith.constant 0 : index
    %c2_27 = arith.constant 2 : index
    %c0_28 = arith.constant 0 : index
    %c0_29 = arith.constant 0 : index
    %29 = vector.load %arg5[%c0_26, %c2_27, %c0_28, %c0_29] : memref<1x4x8x128xf32, #tpu.memory_space<vmem>>, vector<1x1x8x128xf32>
    %30 = vector.shape_cast %29 : vector<1x1x8x128xf32> to vector<8x128xf32>
    %31 = vector.shape_cast %28 : vector<8x128xf32> to vector<1x1x8x128xf32>
    tpu.vector_store %arg5[%c0_26, %c2_27, %c0_28, %c0_29], %31 {strides = array<i32>} : memref<1x4x8x128xf32, #tpu.memory_space<vmem>>, vector<1x1x8x128xf32>,
    %c0_30 = arith.constant 0 : index
    %c3 = arith.constant 3 : index
    %c0_31 = arith.constant 0 : index
    %c0_32 = arith.constant 0 : index
    %32 = vector.load %arg5[%c0_30, %c3, %c0_31, %c0_32] : memref<1x4x8x128xf32, #tpu.memory_space<vmem>>, vector<1x1x8x128xf32>
    %33 = vector.shape_cast %32 : vector<1x1x8x128xf32> to vector<8x128xf32>
    %34 = arith.mulf %9, %9 : vector<2x8x128xf32>
    %cst_33 = arith.constant dense<0.000000e+00> : vector<8x128xf32>
    %35 = vector.multi_reduction <add>, %34, %cst_33 [0] : vector<2x8x128xf32> to vector<8x128xf32>
    %36 = arith.addf %33, %35 : vector<8x128xf32>
    %c0_34 = arith.constant 0 : index
    %c3_35 = arith.constant 3 : index
    %c0_36 = arith.constant 0 : index
    %c0_37 = arith.constant 0 : index
    %37 = vector.load %arg5[%c0_34, %c3_35, %c0_36, %c0_37] : memref<1x4x8x128xf32, #tpu.memory_space<vmem>>, vector<1x1x8x128xf32>
    %38 = vector.shape_cast %37 : vector<1x1x8x128xf32> to vector<8x128xf32>
    %39 = vector.shape_cast %36 : vector<8x128xf32> to vector<1x1x8x128xf32>
    tpu.vector_store %arg5[%c0_34, %c3_35, %c0_36, %c0_37], %39 {strides = array<i32>} : memref<1x4x8x128xf32, #tpu.memory_space<vmem>>, vector<1x1x8x128xf32>,
    return
  }
  func.func @transform_0(%arg0: i32, %arg1: i32) -> (i32, i32) {
    %c1_i32 = arith.constant 1 : i32
    %0 = arith.muli %arg0, %c1_i32 : i32
    %1 = arith.addi %0, %arg1 : i32
    %c0_i32 = arith.constant 0 : i32
    %c0_i32_0 = arith.constant 0 : i32
    return %1, %c0_i32 : i32, i32
  }
  func.func @transform_1(%arg0: i32, %arg1: i32) -> (i32, i32) {
    %c1_i32 = arith.constant 1 : i32
    %0 = arith.muli %arg0, %c1_i32 : i32
    %1 = arith.addi %0, %arg1 : i32
    %c0_i32 = arith.constant 0 : i32
    %c0_i32_0 = arith.constant 0 : i32
    return %1, %c0_i32 : i32, i32
  }
  func.func @transform_2(%arg0: i32, %arg1: i32) -> (i32, i32) {
    %c1_i32 = arith.constant 1 : i32
    %0 = arith.muli %arg0, %c1_i32 : i32
    %1 = arith.addi %0, %arg1 : i32
    %c0_i32 = arith.constant 0 : i32
    %c0_i32_0 = arith.constant 0 : i32
    return %1, %c0_i32 : i32, i32
  }
  func.func @transform_3(%arg0: i32, %arg1: i32) -> (i32, i32, i32, i32) {
    %c0_i32 = arith.constant 0 : i32
    %c0_i32_0 = arith.constant 0 : i32
    %c0_i32_1 = arith.constant 0 : i32
    %c0_i32_2 = arith.constant 0 : i32
    return %arg0, %c0_i32, %c0_i32_0, %c0_i32_1 : i32, i32, i32, i32
  }
}

</mosaic_0001>

<bundles_post_ra>
// kernel: docunet_loss_pow.1
= control target key start
LH: loop header
LB: loop body
LE: loop exit
PB: predicated region body
PF: predicated region fallthrough
CT: control target
= control target key end

     0   :  { %s200_s0 = inlined_call_operand.vmem [shape: f32[16,128], index: 0, kind: input, shape index: {}]   ;;  %s201_s2 = inlined_call_operand.vmem [shape: f32[16,128], index: 2, kind: input, shape index: {}]   ;;  %s202_s1 = inlined_call_operand.vmem [shape: f32[16,128], index: 1, kind: input, shape index: {}]   ;;  %s203_s3 = inlined_call_operand.vmem [shape: f32[1,4,8,128], index: 3, kind: output, shape index: {}]  }
   0x1   :  { %v88_v0 = vld [vmem:[%s201_s2] sm:$0xff]  ;;  %v89_v1 = vld [vmem:[%s201_s2 + $0x8] sm:$0xff] }
   0x2   :  { %v90_v2 = vld [vmem:[%s200_s0] sm:$0xff]  ;;  %v91_v3 = vld [vmem:[%s200_s0 + $0x8] sm:$0xff] }
   0x3   :  { %v92_v4 = vsub.f32 %v90_v2, %v88_v0  ;;  %v94_v5 = vld [vmem:[%s202_s1] sm:$0xff]  ;;  %v95_v6 = vld [vmem:[%s202_s1 + $0x8] sm:$0xff]  ;;  %v93_v7 = vsub.f32 %v91_v3, %v89_v1 }
   0x4   :  { %v96_v8 = vsub.f32 %v94_v5, %v88_v0  ;;  %v97_v9 = vsub.f32 %v95_v6, %v89_v1 }
   0x5   :  { %v104_v10 = vmul.f32 %v92_v4, %v92_v4  ;;  %v99_v11 = vadd.f32 %v93_v7, %v92_v4  ;;  %v105_v12 = vmul.f32 %v93_v7, %v93_v7 }
   0x6   :  { %v111_v13 = vadd.f32 %v97_v9, %v96_v8  ;;  %v116_v14 = vmul.f32 %v96_v8, %v96_v8  ;;  %v117_v15 = vmul.f32 %v97_v9, %v97_v9 }
   0x7   :  { %v106_v16 = vadd.f32 %v105_v12, %v104_v10  ;;  %101 = vst [vmem:[%s203_s3] sm:$0xff] %v99_v11 }
   0x8   :  { %v118_v17 = vadd.f32 %v117_v15, %v116_v14  ;;  %146 = vst [vmem:[%s203_s3 + $0x10] sm:$0xff] %v111_v13 }
   0x9   :  { %144 = vst [vmem:[%s203_s3 + $0x8] sm:$0xff] %v106_v16 }
   0xa   :  { %148 = vst [vmem:[%s203_s3 + $0x18] sm:$0xff] %v118_v17 }

</bundles_post_ra>
